<compile_context>
chip_gen: v6e
topology: v6e:2x2x1
jax: 0.10.0
libtpu: 0.0.40
codegen_flags: <defaults>
</compile_context>

<pallas_src>
import functools

import jax
import jax.numpy as jnp
from jax.experimental import pallas as pl
from jax.experimental.pallas import tpu as pltpu

LANE = 128                 # vreg lane width
SUBLANE = 8                # f32 sublanes per vreg
REP = 4                    # cat((v,v,v,v), dim=1) replication factor
OUT_LANE = REP * LANE      # 512 — lane-dense output block width
ALIGN = SUBLANE * LANE     # 1024 — flat-size alignment for the zero-copy path
MAX_ROWS_PER_TILE = 1024   # 512 KiB input / 2 MiB output per block


def _fused_expand_kernel(x_ref, o_ref):
    x = x_ref[...]                                   # (R, 128) f32
    xsq = x * x
    # relu(x)^2 + x^2 == where(x > 0, 2*x^2, x^2)  (exact in f32)
    y = jnp.where(x > 0, xsq + xsq, xsq)

    # --- exact 4x lane-interleaved replication via one-hot MXU expansion ---
    # Split the f32 value into three bf16-exact chunks (y == y1 + y2 + y3
    # exactly), so each native single-pass bf16 matmul below is exact and the
    # f32 accumulation reconstructs y bit-exactly.
    y1 = y.astype(jnp.bfloat16)
    r = y - y1.astype(jnp.float32)
    y2 = r.astype(jnp.bfloat16)
    y3 = (r - y2.astype(jnp.float32)).astype(jnp.bfloat16)

    # One-hot expansion matrix E[j, k] = 1 iff k // 4 == j, shape (128, 512).
    base = REP * jax.lax.broadcasted_iota(jnp.int32, (LANE, OUT_LANE), 0)
    k = jax.lax.broadcasted_iota(jnp.int32, (LANE, OUT_LANE), 1)
    delta = k - base
    expand = jnp.where((delta >= 0) & (delta < REP), 1.0, 0.0).astype(jnp.bfloat16)

    # Accumulate directly into the output block to keep only one (R, 512)
    # temporary live at a time (bounds kernel VMEM temporaries).
    o_ref[...] = jnp.dot(y1, expand, preferred_element_type=jnp.float32)
    o_ref[...] += jnp.dot(y2, expand, preferred_element_type=jnp.float32)
    o_ref[...] += jnp.dot(y3, expand, preferred_element_type=jnp.float32)


def _default_rows_per_tile(rows):
    # Aim for >=2 grid steps (v7x has 2 TensorCores) while capping the block
    # at MAX_ROWS_PER_TILE rows so the double-buffered footprint stays well
    # inside every generation's default scoped VMEM.
    half = -(-rows // 2)
    half = -(-half // SUBLANE) * SUBLANE
    return max(SUBLANE, min(MAX_ROWS_PER_TILE, half))


@functools.partial(jax.jit, static_argnames=("rows_per_tile",))
def model_forward(x, rows_per_tile=None):
    """x: (N, 1) float32 -> (4*N,) float32, matching Model.forward semantics."""
    n, c = x.shape
    assert c == 1, "broadcast v*v + x*x requires C == 1 (as in PyTorch)"
    assert x.dtype == jnp.float32

    flat = x.reshape(-1)                                  # (N,) — bitcast

    # Pad the flat length to a multiple of 1024 (= 8 sublanes x 128 lanes)
    # only when needed; for 1024-aligned N this whole prologue is free.
    n_pad = pl.cdiv(n, ALIGN) * ALIGN
    padded = n_pad != n
    if padded:
        flat = jnp.pad(flat, (0, n_pad - n))

    rows = n_pad // LANE                                  # multiple of 8
    if rows_per_tile is None:
        rows_per_tile = _default_rows_per_tile(rows)
    rows_per_tile = max(SUBLANE,
                        min(rows, (rows_per_tile // SUBLANE) * SUBLANE))
    grid = (pl.cdiv(rows, rows_per_tile),)                # ragged last block OK

    x2d = flat.reshape(rows, LANE)                        # lane-dense slab

    out2d = pl.pallas_call(
        _fused_expand_kernel,
        out_shape=jax.ShapeDtypeStruct((rows, OUT_LANE), jnp.float32),
        grid=grid,
        in_specs=[pl.BlockSpec((rows_per_tile, LANE), lambda i: (i, 0))],
        out_specs=pl.BlockSpec((rows_per_tile, OUT_LANE), lambda i: (i, 0)),
        compiler_params=pltpu.CompilerParams(
            dimension_semantics=("parallel",),
            vmem_limit_bytes=48 * 1024 * 1024),
    )(x2d)

    out = out2d.reshape(-1)                               # bitcast
    if padded:
        # Only taken for N not a multiple of 1024 (slice copies 4N words).
        out = out[: REP * n]
    return out


def _reference(x):
    r = jnp.maximum(x, 0.0)
    v = jnp.concatenate([r, r, r, r], axis=1)
    return (v * v + x * x).reshape(-1)


if __name__ == "__main__":
    key = jax.random.PRNGKey(0)
    k1, k2, k3 = jax.random.split(key, 3)

    # (a) Tiny shape from the spec (C must be 1 for v*v + x*x to broadcast):
    #     exercises the padded path with a single grid step.
    x_small = jax.random.normal(k1, (5, 1), dtype=jnp.float32)
    out_small = jax.block_until_ready(model_forward(x_small))
    assert out_small.shape == (5 * 4,)
    assert jnp.allclose(out_small, _reference(x_small), atol=1e-6, rtol=1e-6)

    # (b) Misaligned N with a forced small tile: multi-step grid, ragged last
    #     block (24 rows, 16-row tiles) and the pad + slice path.
    x_mid = jax.random.normal(k2, (3000, 1), dtype=jnp.float32)
    out_mid = jax.block_until_ready(model_forward(x_mid, rows_per_tile=16))
    assert out_mid.shape == (3000 * 4,)
    assert jnp.allclose(out_mid, _reference(x_mid), atol=1e-6, rtol=1e-6)

    # (c) 1024-aligned N: zero-copy fast path (no pad, no slice); the default
    #     tile heuristic gives a 2-step parallel grid (both v7x TensorCores).
    x_big = jax.random.normal(k3, (4096, 1), dtype=jnp.float32)
    out_big = jax.block_until_ready(model_forward(x_big))
    assert out_big.shape == (4096 * 4,)
    assert jnp.allclose(out_big, _reference(x_big), atol=1e-6, rtol=1e-6)

    print("KERNEL_OK")
</pallas_src>

<mosaic_0001>
module attributes {stable_mosaic.version = 11 : i64} {
  func.func @_fused_expand_kernel(%arg0: i32, %arg1: memref<8x128xf32, #tpu.memory_space<vmem>>, %arg2: memref<8x512xf32, #tpu.memory_space<vmem>>) attributes {dimension_semantics = [#tpu.dimension_semantics<parallel>], iteration_bounds = array<i64: 1>, scalar_prefetch = 0 : i64, scratch_operands = 0 : i64, tpu.core_type = #tpu.core_type<tc>, window_params = [{transform_indices = @transform_0, window_bounds = array<i64: 8, 128>}, {transform_indices = @transform_1, window_bounds = array<i64: 8, 512>}]} {
    %c0 = arith.constant 0 : index
    %c0_0 = arith.constant 0 : index
    %0 = vector.load %arg1[%c0, %c0_0] : memref<8x128xf32, #tpu.memory_space<vmem>>, vector<8x128xf32>
    %1 = arith.mulf %0, %0 : vector<8x128xf32>
    %cst = arith.constant 0.000000e+00 : f32
    %2 = vector.broadcast %cst : f32 to vector<8x128xf32>
    %3 = arith.cmpf ogt, %0, %2 : vector<8x128xf32>
    %4 = arith.addf %1, %1 : vector<8x128xf32>
    %5 = arith.select %3, %4, %1 : vector<8x128xi1>, vector<8x128xf32>
    %6 = arith.truncf %5 : vector<8x128xf32> to vector<8x128xbf16>
    %7 = arith.extf %6 : vector<8x128xbf16> to vector<8x128xf32>
    %8 = arith.subf %5, %7 : vector<8x128xf32>
    %9 = arith.truncf %8 : vector<8x128xf32> to vector<8x128xbf16>
    %10 = arith.extf %9 : vector<8x128xbf16> to vector<8x128xf32>
    %11 = arith.subf %8, %10 : vector<8x128xf32>
    %12 = arith.truncf %11 : vector<8x128xf32> to vector<8x128xbf16>
    %13 = tpu.iota {dimensions = array<i32: 0>} : vector<128x512xi32>
    %c4_i32 = arith.constant 4 : i32
    %14 = vector.broadcast %c4_i32 : i32 to vector<128x512xi32>
    %15 = arith.muli %14, %13 : vector<128x512xi32>
    %16 = tpu.iota {dimensions = array<i32: 1>} : vector<128x512xi32>
    %17 = arith.subi %16, %15 : vector<128x512xi32>
    %c0_i32 = arith.constant 0 : i32
    %18 = vector.broadcast %c0_i32 : i32 to vector<128x512xi32>
    %19 = arith.cmpi sge, %17, %18 : vector<128x512xi32>
    %c4_i32_1 = arith.constant 4 : i32
    %20 = vector.broadcast %c4_i32_1 : i32 to vector<128x512xi32>
    %21 = arith.cmpi slt, %17, %20 : vector<128x512xi32>
    %22 = arith.andi %19, %21 : vector<128x512xi1>
    %cst_2 = arith.constant 1.000000e+00 : f32
    %cst_3 = arith.constant 0.000000e+00 : f32
    %23 = vector.broadcast %cst_2 : f32 to vector<128x512xf32>
    %24 = vector.broadcast %cst_3 : f32 to vector<128x512xf32>
    %25 = arith.select %22, %23, %24 : vector<128x512xi1>, vector<128x512xf32>
    %26 = arith.truncf %25 : vector<128x512xf32> to vector<128x512xbf16>
    %cst_4 = arith.constant dense<0.000000e+00> : vector<8x512xf32>
    %27 = tpu.matmul %6, %26, %cst_4 {dimension_numbers = #tpu.dot_dimension_numbers<[1], [0], [0], [1], [0, 0, 1, 1], [], []>} : vector<8x128xbf16>, vector<128x512xbf16>, vector<8x512xf32> -> vector<8x512xf32>
    %c0_5 = arith.constant 0 : index
    %c0_6 = arith.constant 0 : index
    %28 = vector.load %arg2[%c0_5, %c0_6] : memref<8x512xf32, #tpu.memory_space<vmem>>, vector<8x512xf32>
    tpu.vector_store %arg2[%c0_5, %c0_6], %27 {strides = array<i32>} : memref<8x512xf32, #tpu.memory_space<vmem>>, vector<8x512xf32>,
    %c0_7 = arith.constant 0 : index
    %c0_8 = arith.constant 0 : index
    %29 = vector.load %arg2[%c0_7, %c0_8] : memref<8x512xf32, #tpu.memory_space<vmem>>, vector<8x512xf32>
    %cst_9 = arith.constant dense<0.000000e+00> : vector<8x512xf32>
    %30 = tpu.matmul %9, %26, %cst_9 {dimension_numbers = #tpu.dot_dimension_numbers<[1], [0], [0], [1], [0, 0, 1, 1], [], []>} : vector<8x128xbf16>, vector<128x512xbf16>, vector<8x512xf32> -> vector<8x512xf32>
    %31 = arith.addf %29, %30 : vector<8x512xf32>
    %c0_10 = arith.constant 0 : index
    %c0_11 = arith.constant 0 : index
    %32 = vector.load %arg2[%c0_10, %c0_11] : memref<8x512xf32, #tpu.memory_space<vmem>>, vector<8x512xf32>
    tpu.vector_store %arg2[%c0_10, %c0_11], %31 {strides = array<i32>} : memref<8x512xf32, #tpu.memory_space<vmem>>, vector<8x512xf32>,
    %c0_12 = arith.constant 0 : index
    %c0_13 = arith.constant 0 : index
    %33 = vector.load %arg2[%c0_12, %c0_13] : memref<8x512xf32, #tpu.memory_space<vmem>>, vector<8x512xf32>
    %cst_14 = arith.constant dense<0.000000e+00> : vector<8x512xf32>
    %34 = tpu.matmul %12, %26, %cst_14 {dimension_numbers = #tpu.dot_dimension_numbers<[1], [0], [0], [1], [0, 0, 1, 1], [], []>} : vector<8x128xbf16>, vector<128x512xbf16>, vector<8x512xf32> -> vector<8x512xf32>
    %35 = arith.addf %33, %34 : vector<8x512xf32>
    %c0_15 = arith.constant 0 : index
    %c0_16 = arith.constant 0 : index
    %36 = vector.load %arg2[%c0_15, %c0_16] : memref<8x512xf32, #tpu.memory_space<vmem>>, vector<8x512xf32>
    tpu.vector_store %arg2[%c0_15, %c0_16], %35 {strides = array<i32>} : memref<8x512xf32, #tpu.memory_space<vmem>>, vector<8x512xf32>,
    return
  }
  func.func @transform_0(%arg0: i32) -> (i32, i32) {
    %c0_i32 = arith.constant 0 : i32
    %c0_i32_0 = arith.constant 0 : i32
    return %arg0, %c0_i32 : i32, i32
  }
  func.func @transform_1(%arg0: i32) -> (i32, i32) {
    %c0_i32 = arith.constant 0 : i32
    %c0_i32_0 = arith.constant 0 : i32
    return %arg0, %c0_i32 : i32, i32
  }
}

</mosaic_0001>

<bundles_post_ra>
// kernel: model_forward.1
= control target key start
LH: loop header
LB: loop body
LE: loop exit
PB: predicated region body
PF: predicated region fallthrough
CT: control target
= control target key end

     0   :  { %v21_v0 = vlaneseq  ;;  %v883_v1 = vmov 0   ;;  %v1573_v20 = vmov 0  ;;  %v884_v23 = vmov 1.0|1.0   ;;  %s1514_s0 = inlined_call_operand.vmem [shape: f32[8,128], index: 0, kind: input, shape index: {}]   ;;  %s1515_s1 = inlined_call_operand.vmem [shape: f32[8,512], index: 1, kind: output, shape index: {}]  }
   0x1   :  { %443 = vmatprep.mubr.bf16.mxu0 %v883_v1  ;;  %484 = vmatprep.mubr.bf16.mxu1 %v883_v1  ;;  %v1575_v25 = vmov 0  ;;  %v1577_v28 = vmov 0  ;;  %v1579_v33 = vmov 0  ;;  %v1581_v37 = vmov 0 }
   0x2   :  { %v897_v2 = vshrl.u32 %v21_v0, 7  ;;  %v899_v3 = vand.u32 127, %v21_v0  ;;  %v1583_v41 = vmov 0  ;;  %v1585_v44 = vmov 0 }
   0x3   :  { %v1587_v49 = vmov 0  ;;  %v1589_v53 = vmov 0  ;;  %v1591_v57 = vmov 0  ;;  %v1593_v63 = vmov 0 }
   0x4   :  { %v36_v4 = vadd.s32 112, %v897_v2  ;;  %v37_v5 = vadd.s32 120, %v897_v2  ;;  %v904_v6 = vadd.s32 128, %v899_v3  ;;  %v907_v7 = vadd.s32 384, %v899_v3 }
   0x5   :  { %v34_v10 = vadd.s32 96, %v897_v2  ;;  %v916_v16 = vadd.s32 256, %v899_v3  ;;  %v35_v17 = vadd.s32 104, %v897_v2  ;;  %v32_v31 = vadd.s32 80, %v897_v2 }
   0x6   :  { %v52_v8 = vmul.u32 4, %v36_v4  ;;  %v53_v9 = vmul.u32 4, %v37_v5  ;;  %v33_v32 = vadd.s32 88, %v897_v2  ;;  %v30_v47 = vadd.s32 64, %v897_v2 }
   0x7   :  { %v50_v19 = vmul.u32 4, %v34_v10  ;;  %v51_v22 = vmul.u32 4, %v35_v17  ;;  %v31_v48 = vadd.s32 72, %v897_v2  ;;  %v28_v59 = vadd.s32 48, %v897_v2 }
   0x8   :  { %v116_v11 = vsub.s32 %v904_v6, %v52_v8  ;;  %v120_v12 = vsub.s32 %v904_v6, %v53_v9  ;;  %v118_v13 = vsub.s32 %v907_v7, %v52_v8  ;;  %v122_v14 = vsub.s32 %v907_v7, %v53_v9 }
   0x9   :  { %v115_v15 = vsub.s32 %v899_v3, %v52_v8  ;;  %v119_v18 = vsub.s32 %v899_v3, %v53_v9  ;;  %v117_v21 = vsub.s32 %v916_v16, %v52_v8  ;;  %v121_v24 = vsub.s32 %v916_v16, %v53_v9 }
   0xa   :  { %vm180_vm0 = vcmp.ge.s32.totalorder %v116_v11, 0  ;;  %vm184_vm1 = vcmp.ge.s32.totalorder %v120_v12, 0  ;;  %vm244_vm2 = vcmp.lt.s32.totalorder %v116_v11, 4  ;;  %vm248_vm3 = vcmp.lt.s32.totalorder %v120_v12, 4 }
   0xb   :  { %vm308_vm4 = vmand %vm180_vm0, %vm244_vm2  ;;  %vm182_vm5 = vcmp.ge.s32.totalorder %v118_v13, 0  ;;  %vm246_vm6 = vcmp.lt.s32.totalorder %v118_v13, 4  ;;  %vm186_vm8 = vcmp.ge.s32.totalorder %v122_v14, 0  ;;  %vm250_vm9 = vcmp.lt.s32.totalorder %v122_v14, 4 }
   0xc   :  { %vm312_vm7 = vmand %vm184_vm1, %vm248_vm3  ;;  %vm179_vm12 = vcmp.ge.s32.totalorder %v115_v15, 0  ;;  %vm243_vm13 = vcmp.lt.s32.totalorder %v115_v15, 4  ;;  %vm183_vm15 = vcmp.ge.s32.totalorder %v119_v18, 0  ;;  %vm247_vm0 = vcmp.lt.s32.totalorder %v119_v18, 4 }
   0xd   :  { %vm920_vm10 = vmpackc.low %vm312_vm7, %vm308_vm4  ;;  %v108_v26 = vsub.s32 %v904_v6, %v50_v19  ;;  %vm181_vm3 = vcmp.ge.s32.totalorder %v117_v21, 0  ;;  %vm245_vm4 = vcmp.lt.s32.totalorder %v117_v21, 4  ;;  %v112_v27 = vsub.s32 %v904_v6, %v51_v22 }
   0xe   :  { %v1574_v20 = vsel %vm920_vm10, 4294967295, %v1573_v20  ;;  %690 = vmatprep.subr.msk.bf16.mxu0 %vm920_vm10, %v884_v23  ;;  %vm310_vm11 = vmand %vm182_vm5, %vm246_vm6  ;;  %vm185_vm6 = vcmp.ge.s32.totalorder %v121_v24, 0  ;;  %vm249_vm7 = vcmp.lt.s32.totalorder %v121_v24, 4  ;;  %v110_v29 = vsub.s32 %v907_v7, %v50_v19 }
   0xf   :  { %vm314_vm14 = vmand %vm186_vm8, %vm250_vm9  ;;  %v114_v30 = vsub.s32 %v907_v7, %v51_v22  ;;  %v107_v34 = vsub.s32 %v899_v3, %v50_v19  ;;  %v111_v35 = vsub.s32 %v899_v3, %v51_v22  ;;  %v48_v36 = vmul.u32 4, %v32_v31 }
  0x10   :  { %vm929_vm1 = vmpackc.low %vm314_vm14, %vm310_vm11  ;;  %vm172_vm11 = vcmp.ge.s32.totalorder %v108_v26, 0  ;;  %vm176_vm14 = vcmp.ge.s32.totalorder %v112_v27, 0  ;;  %v109_v38 = vsub.s32 %v916_v16, %v50_v19  ;;  %v49_v39 = vmul.u32 4, %v33_v32 }
  0x11   :  { %v1576_v25 = vsel %vm929_vm1, 4294967295, %v1575_v25  ;;  %722 = vmatprep.subr.msk.bf16.mxu1 %vm929_vm1, %v884_v23  ;;  %vm307_vm2 = vmand %vm179_vm12, %vm243_vm13  ;;  %vm236_vm12 = vcmp.lt.s32.totalorder %v108_v26, 4  ;;  %v113_v40 = vsub.s32 %v916_v16, %v51_v22  ;;  %v100_v42 = vsub.s32 %v904_v6, %v48_v36 }
  0x12   :  { %vm311_vm5 = vmand %vm183_vm15, %vm247_vm0  ;;  %vm240_vm15 = vcmp.lt.s32.totalorder %v112_v27, 4  ;;  %v104_v43 = vsub.s32 %v904_v6, %v49_v39  ;;  %v102_v45 = vsub.s32 %v907_v7, %v48_v36  ;;  %v106_v46 = vsub.s32 %v907_v7, %v49_v39 }
  0x13   :  { %vm938_vm8 = vmpackc.low %vm311_vm5, %vm307_vm2  ;;  %v99_v50 = vsub.s32 %v899_v3, %v48_v36  ;;  %v103_v51 = vsub.s32 %v899_v3, %v49_v39  ;;  %v46_v52 = vmul.u32 4, %v30_v47  ;;  %v101_v54 = vsub.s32 %v916_v16, %v48_v36 }
  0x14   :  { %v1578_v28 = vsel %vm938_vm8, 4294967295, %v1577_v28  ;;  %692 = vmatpush1.bf16.msk.msra.mxu0 %vm938_vm8, %v884_v23  ;;  %vm309_vm9 = vmand %vm181_vm3, %vm245_vm4  ;;  %vm174_vm3 = vcmp.ge.s32.totalorder %v110_v29, 0  ;;  %vm238_vm4 = vcmp.lt.s32.totalorder %v110_v29, 4  ;;  %v47_v55 = vmul.u32 4, %v31_v48 }
  0x15   :  { %vm313_vm13 = vmand %vm185_vm6, %vm249_vm7  ;;  %vm178_vm6 = vcmp.ge.s32.totalorder %v114_v30, 0  ;;  %vm242_vm7 = vcmp.lt.s32.totalorder %v114_v30, 4  ;;  %v105_v56 = vsub.s32 %v916_v16, %v49_v39  ;;  %v92_v58 = vsub.s32 %v904_v6, %v46_v52 }
  0x16   :  { %vm949_vm0 = vmpackc.low %vm313_vm13, %vm309_vm9  ;;  %v96_v60 = vsub.s32 %v904_v6, %v47_v55  ;;  %v29_v61 = vadd.s32 56, %v897_v2  ;;  %v94_v62 = vsub.s32 %v907_v7, %v46_v52  ;;  %v98_v0 = vsub.s32 %v907_v7, %v47_v55 }
  0x17   :  { %v1580_v33 = vsel %vm949_vm0, 4294967295, %v1579_v33  ;;  %724 = vmatpush1.bf16.msk.msra.mxu1 %vm949_vm0, %v884_v23  ;;  %vm300_vm2 = vmand %vm172_vm11, %vm236_vm12  ;;  %vm171_vm11 = vcmp.ge.s32.totalorder %v107_v34, 0  ;;  %vm235_vm12 = vcmp.lt.s32.totalorder %v107_v34, 4  ;;  %v91_v4 = vsub.s32 %v899_v3, %v46_v52 }
  0x18   :  { %vm304_vm5 = vmand %vm176_vm14, %vm240_vm15  ;;  %vm175_vm14 = vcmp.ge.s32.totalorder %v111_v35, 0  ;;  %vm239_vm15 = vcmp.lt.s32.totalorder %v111_v35, 4  ;;  %v24_v5 = vadd.s32 16, %v897_v2  ;;  %v95_v8 = vsub.s32 %v899_v3, %v47_v55 }
  0x19   :  { %vm958_vm8 = vmpackc.low %vm304_vm5, %vm300_vm2  ;;  %vm173_vm5 = vcmp.ge.s32.totalorder %v109_v38, 0  ;;  %v25_v9 = vadd.s32 24, %v897_v2  ;;  %v1029_v10 = vmul.u32 4, %v28_v59  ;;  %v1031_v11 = vmul.u32 4, %v29_v61 }
  0x1a   :  { %v1582_v37 = vsel %vm958_vm8, 4294967295, %v1581_v37  ;;  %694 = vmatprep.subr.msk.bf16.mxu0 %vm958_vm8, %v884_v23  ;;  %vm302_vm9 = vmand %vm174_vm3, %vm238_vm4  ;;  %vm237_vm3 = vcmp.lt.s32.totalorder %v109_v38, 4  ;;  %vm177_vm8 = vcmp.ge.s32.totalorder %v113_v40, 0  ;;  %v1595_v12 = vmov 0 }
  0x1b   :  { %vm306_vm13 = vmand %vm178_vm6, %vm242_vm7  ;;  %vm241_vm6 = vcmp.lt.s32.totalorder %v113_v40, 4  ;;  %v93_v13 = vsub.s32 %v916_v16, %v46_v52  ;;  %v97_v14 = vsub.s32 %v916_v16, %v47_v55  ;;  %vm159_vm1 = vcmp.ge.s32.totalorder %v95_v8, 0 }
  0x1c   :  { %vm967_vm0 = vmpackc.low %vm306_vm13, %vm302_vm9  ;;  %vm164_vm13 = vcmp.ge.s32.totalorder %v100_v42, 0  ;;  %v40_v15 = vmul.u32 4, %v24_v5  ;;  %v41_v17 = vmul.u32 4, %v25_v9  ;;  %v23_v18 = vadd.s32 8, %v897_v2 }
  0x1d   :  { %v1584_v41 = vsel %vm967_vm0, 4294967295, %v1583_v41  ;;  %726 = vmatprep.subr.msk.bf16.mxu1 %vm967_vm0, %v884_v23  ;;  %vm299_vm2 = vmand %vm171_vm11, %vm235_vm12  ;;  %vm228_vm11 = vcmp.lt.s32.totalorder %v100_v42, 4  ;;  %v1597_v19 = vmov 0  ;;  %v84_v21 = vsub.s32 %v904_v6, %v1029_v10 }
  0x1e   :  { %vm303_vm4 = vmand %vm175_vm14, %vm239_vm15  ;;  %vm168_vm14 = vcmp.ge.s32.totalorder %v104_v43, 0  ;;  %vm232_vm15 = vcmp.lt.s32.totalorder %v104_v43, 4  ;;  %v88_v22 = vsub.s32 %v904_v6, %v1031_v11  ;;  %v1056_v24 = vsub.s32 %v904_v6, %v40_v15 }
  0x1f   :  { %vm976_vm7 = vmpackc.low %vm303_vm4, %vm299_vm2  ;;  %vm230_vm4 = vcmp.lt.s32.totalorder %v102_v45, 4  ;;  %v1059_v26 = vsub.s32 %v904_v6, %v41_v17  ;;  %v1062_v27 = vsub.s32 %v907_v7, %v40_v15  ;;  %v1065_v29 = vsub.s32 %v907_v7, %v41_v17 }
  0x20   :  { %v1586_v44 = vsel %vm976_vm7, 4294967295, %v1585_v44  ;;  %696 = vmatpush1.bf16.msk.msra.mxu0 %vm976_vm7, %v884_v23  ;;  %vm301_vm9 = vmand %vm173_vm5, %vm237_vm3  ;;  %vm166_vm3 = vcmp.ge.s32.totalorder %v102_v45, 0  ;;  %vm234_vm7 = vcmp.lt.s32.totalorder %v106_v46, 4  ;;  %v1070_v30 = vsub.s32 %v899_v3, %v40_v15 }
  0x21   :  { %vm305_vm12 = vmand %vm177_vm8, %vm241_vm6  ;;  %vm170_vm6 = vcmp.ge.s32.totalorder %v106_v46, 0  ;;  %v1073_v31 = vsub.s32 %v899_v3, %v41_v17  ;;  %v1076_v32 = vsub.s32 %v916_v16, %v40_v15  ;;  %v1079_v34 = vsub.s32 %v916_v16, %v41_v17 }
  0x22   :  { %vm987_vm2 = vmpackc.low %vm305_vm12, %vm301_vm9  ;;  %v1600_v35 = vmov 0  ;;  %v38_v36 = vmul.u32 4, %v897_v2  ;;  %v39_v38 = vmul.u32 4, %v23_v18  ;;  %v26_v39 = vadd.s32 32, %v897_v2 }
  0x23   :  { %v1588_v49 = vsel %vm987_vm2, 4294967295, %v1587_v49  ;;  %728 = vmatpush1.bf16.msk.msra.mxu1 %vm987_vm2, %v884_v23  ;;  %vm292_vm5 = vmand %vm164_vm13, %vm228_vm11  ;;  %vm163_vm13 = vcmp.ge.s32.totalorder %v99_v50, 0  ;;  %vm227_vm11 = vcmp.lt.s32.totalorder %v99_v50, 4  ;;  %v27_v40 = vadd.s32 40, %v897_v2 }
  0x24   :  { %vm296_vm8 = vmand %vm168_vm14, %vm232_vm15  ;;  %vm167_vm14 = vcmp.ge.s32.totalorder %v103_v51, 0  ;;  %vm231_vm15 = vcmp.lt.s32.totalorder %v103_v51, 4  ;;  %v86_v42 = vsub.s32 %v907_v7, %v1029_v10  ;;  %v90_v43 = vsub.s32 %v907_v7, %v1031_v11 }
  0x25   :  { %vm996_vm0 = vmpackc.low %vm296_vm8, %vm292_vm5  ;;  %vm169_vm8 = vcmp.ge.s32.totalorder %v105_v56, 0  ;;  %v1602_v45 = vmov 0  ;;  %v1108_v2 = vsub.s32 %v904_v6, %v38_v36  ;;  %v1111_v46 = vsub.s32 %v904_v6, %v39_v38 }
  0x26   :  { %v1590_v53 = vsel %vm996_vm0, 4294967295, %v1589_v53  ;;  %698 = vmatprep.subr.msk.bf16.mxu0 %vm996_vm0, %v884_v23  ;;  %vm294_vm9 = vmand %vm166_vm3, %vm230_vm4  ;;  %vm165_vm3 = vcmp.ge.s32.totalorder %v101_v54, 0  ;;  %vm229_vm4 = vcmp.lt.s32.totalorder %v101_v54, 4  ;;  %v1114_v47 = vsub.s32 %v907_v7, %v38_v36 }
  0x27   :  { %vm298_vm12 = vmand %vm170_vm6, %vm234_vm7  ;;  %vm233_vm6 = vcmp.lt.s32.totalorder %v105_v56, 4  ;;  %v1117_v48 = vsub.s32 %v907_v7, %v39_v38  ;;  %v1121_v50 = vsub.s32 %v899_v3, %v38_v36  ;;  %v1124_v51 = vsub.s32 %v899_v3, %v39_v38 }
  0x28   :  { %vm1005_vm2 = vmpackc.low %vm298_vm12, %vm294_vm9  ;;  %vm220_vm12 = vcmp.lt.s32.totalorder %v92_v58, 4  ;;  %v1127_v52 = vsub.s32 %v916_v16, %v38_v36  ;;  %v1130_v54 = vsub.s32 %v916_v16, %v39_v38  ;;  %v1605_v55 = vmov 0 }
  0x29   :  { %v1592_v57 = vsel %vm1005_vm2, 4294967295, %v1591_v57  ;;  %730 = vmatprep.subr.msk.bf16.mxu1 %vm1005_vm2, %v884_v23  ;;  %vm291_vm5 = vmand %vm163_vm13, %vm227_vm11  ;;  %vm156_vm11 = vcmp.ge.s32.totalorder %v92_v58, 0  ;;  %vm223_vm2 = vcmp.lt.s32.totalorder %v95_v8, 4  ;;  %v83_v56 = vsub.s32 %v899_v3, %v1029_v10 }
  0x2a   :  { %vm295_vm7 = vmand %vm167_vm14, %vm231_vm15  ;;  %vm160_vm15 = vcmp.ge.s32.totalorder %v96_v60, 0  ;;  %v87_v58 = vsub.s32 %v899_v3, %v1031_v11  ;;  %v42_v59 = vmul.u32 4, %v26_v39  ;;  %v85_v61 = vsub.s32 %v916_v16, %v1029_v10 }
  0x2b   :  { %vm1017_vm9 = vmpackc.low %vm295_vm7, %vm291_vm5  ;;  %vm224_vm5 = vcmp.lt.s32.totalorder %v96_v60, 4  ;;  %v1607_v60 = vmov 0  ;;  %v1611_v9 = vmov 0  ;;  %v1619_v18 = vmov 0 }
  0x2c   :  { %v1594_v63 = vsel %vm1017_vm9, 4294967295, %v1593_v63  ;;  %700 = vmatpush1.bf16.msk.msra.mxu0 %vm1017_vm9, %v884_v23  ;;  %vm293_vm13 = vmand %vm165_vm3, %vm229_vm4  ;;  %vm162_vm4 = vcmp.ge.s32.totalorder %v98_v0, 0  ;;  %vm155_vm9 = vcmp.ge.s32.totalorder %v91_v4, 0  ;;  %v76_v5 = vsub.s32 %v904_v6, %v42_v59 }
  0x2d   :  { %vm297_vm14 = vmand %vm169_vm8, %vm233_vm6  ;;  %vm222_vm8 = vcmp.lt.s32.totalorder %v94_v62, 4  ;;  %vm226_vm6 = vcmp.lt.s32.totalorder %v98_v0, 4  ;;  %v89_v0 = vsub.s32 %v916_v16, %v1031_v11  ;;  %v78_v10 = vsub.s32 %v907_v7, %v42_v59 }
  0x2e   :  { %vm1033_vm7 = vmpackc.low %vm297_vm14, %vm293_vm13  ;;  %vm219_vm14 = vcmp.lt.s32.totalorder %v91_v4, 4  ;;  %v1609_v4 = vmov 0  ;;  %v77_v15 = vsub.s32 %v916_v16, %v42_v59 }
  0x2f   :  { %v1596_v12 = vsel %vm1033_vm7, 4294967295, %v1595_v12  ;;  %732 = vmatpush1.bf16.msk.msra.mxu1 %vm1033_vm7, %v884_v23  ;;  %vm284_vm3 = vmand %vm156_vm11, %vm220_vm12  ;;  %vm1599_vm11 = vcmp.ge.s32.totalorder %v94_v62, 0  ;;  %v43_v62 = vmul.u32 4, %v27_v40  ;;  %vm153_vm7 = vcmp.ge.s32.totalorder %v89_v0, 0 }
  0x30   :  { %vm288_vm0 = vmand %vm160_vm15, %vm224_vm5 }
  0x31   :  { %vm1043_vm13 = vmpackc.low %vm288_vm0, %vm284_vm3  ;;  %vm216_vm3 = vcmp.lt.s32.totalorder %v88_v22, 4  ;;  %v80_v8 = vsub.s32 %v904_v6, %v43_v62  ;;  %v82_v11 = vsub.s32 %v907_v7, %v43_v62  ;;  %v1613_v6 = vmov 0 }
  0x32   :  { %v1598_v19 = vsel %vm1043_vm13, 4294967295, %v1597_v19  ;;  %702 = vmatprep.subr.msk.bf16.mxu0 %vm1043_vm13, %v884_v23  ;;  %vm286_vm12 = vmand %vm1599_vm11, %vm222_vm8  ;;  %vm225_vm11 = vcmp.lt.s32.totalorder %v97_v14, 4  ;;  %v1615_v7 = vmov 0  ;;  %v81_v17 = vsub.s32 %v916_v16, %v43_v62 }
  0x33   :  { %vm290_vm0 = vmand %vm162_vm4, %vm226_vm6  ;;  %vm221_vm4 = vcmp.lt.s32.totalorder %v93_v13, 4  ;;  %vm161_vm6 = vcmp.ge.s32.totalorder %v97_v14, 0  ;;  %v79_v14 = vsub.s32 %v899_v3, %v43_v62  ;;  %vm205_vm13 = vcmp.lt.s32.totalorder %v77_v15, 4 }
  0x34   :  { %vm1081_vm15 = vmpackc.low %vm290_vm0, %vm286_vm12  ;;  %vm212_vm0 = vcmp.lt.s32.totalorder %v84_v21, 4  ;;  %v1621_v16 = vmov 0 }
  0x35   :  { %v1601_v35 = vsel %vm1081_vm15, 4294967295, %v1600_v35  ;;  %734 = vmatprep.subr.msk.bf16.mxu1 %vm1081_vm15, %v884_v23  ;;  %vm283_vm5 = vmand %vm155_vm9, %vm219_vm14  ;;  %vm148_vm9 = vcmp.ge.s32.totalorder %v84_v21, 0  ;;  %vm152_vm14 = vcmp.ge.s32.totalorder %v88_v22, 0  ;;  %v1623_v21 = vmov 0 }
  0x36   :  { %vm287_vm8 = vmand %vm159_vm1, %vm223_vm2  ;;  %vm1604_vm1 = vcmp.ge.s32.totalorder %v93_v13, 0  ;;  %v75_v13 = vsub.s32 %v899_v3, %v42_v59  ;;  %v1617_v3 = vmov 0  ;;  %v1625_v22 = vmov 0 }
  0x37   :  { %vm1099_vm12 = vmpackc.low %vm287_vm8, %vm283_vm5 }
  0x38   :  { %v1603_v45 = vsel %vm1099_vm12, 4294967295, %v1602_v45  ;;  %704 = vmatpush1.bf16.msk.msra.mxu0 %vm1099_vm12, %v884_v23  ;;  %vm285_vm2 = vmand %vm1604_vm1, %vm221_vm4 }
  0x39   :  { %vm289_vm5 = vmand %vm161_vm6, %vm225_vm11  ;;  %vm150_vm6 = vcmp.ge.s32.totalorder %v86_v42, 0  ;;  %vm214_vm11 = vcmp.lt.s32.totalorder %v86_v42, 4 }
  0x3a   :  { %vm1132_vm4 = vmpackc.low %vm289_vm5, %vm285_vm2  ;;  %vm154_vm2 = vcmp.ge.s32.totalorder %v90_v43, 0  ;;  %vm218_vm5 = vcmp.lt.s32.totalorder %v90_v43, 4 }
  0x3b   :  { %v1606_v55 = vsel %vm1132_vm4, 4294967295, %v1605_v55  ;;  %736 = vmatpush1.bf16.msk.msra.mxu1 %vm1132_vm4, %v884_v23  ;;  %vm276_vm8 = vmand %vm148_vm9, %vm212_vm0  ;;  %vm147_vm0 = vcmp.ge.s32.totalorder %v83_v56, 0  ;;  %vm211_vm4 = vcmp.lt.s32.totalorder %v83_v56, 4 }
  0x3c   :  { %vm280_vm1 = vmand %vm152_vm14, %vm216_vm3  ;;  %vm151_vm14 = vcmp.ge.s32.totalorder %v87_v58, 0 }
  0x3d   :  { %vm1147_vm12 = vmpackc.low %vm280_vm1, %vm276_vm8  ;;  %vm215_vm8 = vcmp.lt.s32.totalorder %v87_v58, 4 }
  0x3e   :  { %v1608_v60 = vsel %vm1147_vm12, 4294967295, %v1607_v60  ;;  %706 = vmatprep.subr.msk.bf16.mxu0 %vm1147_vm12, %v884_v23  ;;  %vm278_vm9 = vmand %vm150_vm6, %vm214_vm11  ;;  %vm149_vm6 = vcmp.ge.s32.totalorder %v85_v61, 0  ;;  %vm213_vm11 = vcmp.lt.s32.totalorder %v85_v61, 4 }
  0x3f   :  { %vm282_vm3 = vmand %vm154_vm2, %vm218_vm5  ;;  %vm217_vm2 = vcmp.lt.s32.totalorder %v89_v0, 4 }
  0x40   :  { %vm1158_vm1 = vmpackc.low %vm282_vm3, %vm278_vm9  ;;  %vm140_vm3 = vcmp.ge.s32.totalorder %v76_v5, 0 }
  0x41   :  { %v1610_v4 = vsel %vm1158_vm1, 4294967295, %v1609_v4  ;;  %738 = vmatprep.subr.msk.bf16.mxu1 %vm1158_vm1, %v884_v23  ;;  %vm275_vm12 = vmand %vm147_vm0, %vm211_vm4  ;;  %vm204_vm4 = vcmp.lt.s32.totalorder %v76_v5, 4  ;;  %vm144_vm1 = vcmp.ge.s32.totalorder %v80_v8, 0 }
  0x42   :  { %vm279_vm15 = vmand %vm151_vm14, %vm215_vm8  ;;  %vm208_vm14 = vcmp.lt.s32.totalorder %v80_v8, 4 }
  0x43   :  { %vm1167_vm5 = vmpackc.low %vm279_vm15, %vm275_vm12  ;;  %vm142_vm12 = vcmp.ge.s32.totalorder %v78_v10, 0 }
  0x44   :  { %v1612_v9 = vsel %vm1167_vm5, 4294967295, %v1611_v9  ;;  %708 = vmatpush1.bf16.msk.msra.mxu0 %vm1167_vm5, %v884_v23  ;;  %vm277_vm9 = vmand %vm149_vm6, %vm213_vm11  ;;  %vm206_vm6 = vcmp.lt.s32.totalorder %v78_v10, 4  ;;  %vm146_vm5 = vcmp.ge.s32.totalorder %v82_v11, 0 }
  0x45   :  { %vm281_vm0 = vmand %vm153_vm7, %vm217_vm2  ;;  %vm210_vm7 = vcmp.lt.s32.totalorder %v82_v11, 4 }
  0x46   :  { %vm1176_vm8 = vmpackc.low %vm281_vm0, %vm277_vm9  ;;  %vm139_vm0 = vcmp.ge.s32.totalorder %v75_v13, 0 }
  0x47   :  { %v1614_v6 = vsel %vm1176_vm8, 4294967295, %v1613_v6  ;;  %740 = vmatpush1.bf16.msk.msra.mxu1 %vm1176_vm8, %v884_v23  ;;  %vm268_vm15 = vmand %vm140_vm3, %vm204_vm4  ;;  %vm203_vm3 = vcmp.lt.s32.totalorder %v75_v13, 4  ;;  %vm143_vm8 = vcmp.ge.s32.totalorder %v79_v14, 0 }
  0x48   :  { %vm272_vm11 = vmand %vm144_vm1, %vm208_vm14  ;;  %vm207_vm1 = vcmp.lt.s32.totalorder %v79_v14, 4 }
  0x49   :  { %vm1185_vm2 = vmpackc.low %vm272_vm11, %vm268_vm15  ;;  %vm141_vm11 = vcmp.ge.s32.totalorder %v77_v15, 0 }
  0x4a   :  { %v1616_v7 = vsel %vm1185_vm2, 4294967295, %v1615_v7  ;;  %710 = vmatprep.subr.msk.bf16.mxu0 %vm1185_vm2, %v884_v23  ;;  %vm270_vm9 = vmand %vm142_vm12, %vm206_vm6  ;;  %vm145_vm12 = vcmp.ge.s32.totalorder %v81_v17, 0  ;;  %vm209_vm6 = vcmp.lt.s32.totalorder %v81_v17, 4 }
  0x4b   :  { %vm274_vm4 = vmand %vm146_vm5, %vm210_vm7  ;;  %vm132_vm7 = vcmp.ge.s32.totalorder %v1056_v24, 0 }
  0x4c   :  { %vm1194_vm14 = vmpackc.low %vm274_vm4, %vm270_vm9  ;;  %vm196_vm9 = vcmp.lt.s32.totalorder %v1056_v24, 4  ;;  %v9_v24 = vld [vmem:[%s1514_s0] sm:$0xff] }
  0x4d   :  { %v1618_v3 = vsel %vm1194_vm14, 4294967295, %v1617_v3  ;;  %742 = vmatprep.subr.msk.bf16.mxu1 %vm1194_vm14, %v884_v23  ;;  %vm267_vm15 = vmand %vm139_vm0, %vm203_vm3  ;;  %vm136_vm0 = vcmp.ge.s32.totalorder %v1059_v26, 0 }
  0x4e   :  { %vm271_vm2 = vmand %vm143_vm8, %vm207_vm1  ;;  %vm200_vm8 = vcmp.lt.s32.totalorder %v1059_v26, 4  ;;  %vm198_vm1 = vcmp.lt.s32.totalorder %v1062_v27, 4  ;;  %v1627_v26 = vmov 0 }
  0x4f   :  { %vm1201_vm10 = vmpackc.low %vm271_vm2, %vm267_vm15 }
  0x50   :  { %v1620_v18 = vsel %vm1201_vm10, 4294967295, %v1619_v18  ;;  %712 = vmatpush1.bf16.msk.msra.mxu0 %vm1201_vm10, %v884_v23  ;;  %vm269_vm5 = vmand %vm141_vm11, %vm205_vm13  ;;  %vm134_vm13 = vcmp.ge.s32.totalorder %v1062_v27, 0  ;;  %vm138_vm11 = vcmp.ge.s32.totalorder %v1065_v29, 0  ;;  %v10_v27 = vmul.f32 %v9_v24, %v9_v24 }
  0x51   :  { %vm273_vm4 = vmand %vm145_vm12, %vm209_vm6  ;;  %vm202_vm12 = vcmp.lt.s32.totalorder %v1065_v29, 4  ;;  %v1629_v29 = vmov 0 }
  0x52   :  { %vm1212_vm3 = vmpackc.low %vm273_vm4, %vm269_vm5 }
  0x53   :  { %v1622_v16 = vsel %vm1212_vm3, 4294967295, %v1621_v16  ;;  %744 = vmatpush1.bf16.msk.msra.mxu1 %vm1212_vm3, %v884_v23  ;;  %vm260_vm2 = vmand %vm132_vm7, %vm196_vm9  ;;  %vm131_vm7 = vcmp.ge.s32.totalorder %v1070_v30, 0  ;;  %vm195_vm9 = vcmp.lt.s32.totalorder %v1070_v30, 4  ;;  %v12_v30 = vadd.f32 %v10_v27, %v10_v27 }
  0x54   :  { %vm264_vm15 = vmand %vm136_vm0, %vm200_vm8  ;;  %vm135_vm0 = vcmp.ge.s32.totalorder %v1073_v31, 0  ;;  %vm199_vm8 = vcmp.lt.s32.totalorder %v1073_v31, 4  ;;  %v1631_v31 = vmov 0 }
  0x55   :  { %vm1223_vm6 = vmpackc.low %vm264_vm15, %vm260_vm2 }
  0x56   :  { %v1624_v21 = vsel %vm1223_vm6, 4294967295, %v1623_v21  ;;  %714 = vmatprep.subr.msk.bf16.mxu0 %vm1223_vm6, %v884_v23  ;;  %vm262_vm5 = vmand %vm134_vm13, %vm198_vm1  ;;  %vm133_vm13 = vcmp.ge.s32.totalorder %v1076_v32, 0  ;;  %vm197_vm1 = vcmp.lt.s32.totalorder %v1076_v32, 4 }
  0x57   :  { %vm266_vm4 = vmand %vm138_vm11, %vm202_vm12  ;;  %vm137_vm11 = vcmp.ge.s32.totalorder %v1079_v34, 0  ;;  %vm201_vm12 = vcmp.lt.s32.totalorder %v1079_v34, 4 }
  0x58   :  { %vm1234_vm3 = vmpackc.low %vm266_vm4, %vm262_vm5  ;;  %vm188_vm4 = vcmp.lt.s32.totalorder %v1108_v2, 4 }
  0x59   :  { %v1626_v22 = vsel %vm1234_vm3, 4294967295, %v1625_v22  ;;  %746 = vmatprep.subr.msk.bf16.mxu1 %vm1234_vm3, %v884_v23  ;;  %vm259_vm2 = vmand %vm131_vm7, %vm195_vm9  ;;  %vm124_vm9 = vcmp.ge.s32.totalorder %v1108_v2, 0 }
  0x5a   :  { %vm263_vm15 = vmand %vm135_vm0, %vm199_vm8  ;;  %vm128_vm0 = vcmp.ge.s32.totalorder %v1111_v46, 0  ;;  %vm192_vm8 = vcmp.lt.s32.totalorder %v1111_v46, 4 }
  0x5b   :  { %vm1248_vm5 = vmpackc.low %vm263_vm15, %vm259_vm2 }
  0x5c   :  { %v1628_v26 = vsel %vm1248_vm5, 4294967295, %v1627_v26  ;;  %716 = vmatpush1.bf16.msk.msra.mxu0 %vm1248_vm5, %v884_v23  ;;  %vm261_vm7 = vmand %vm133_vm13, %vm197_vm1  ;;  %vm126_vm13 = vcmp.ge.s32.totalorder %v1114_v47, 0  ;;  %vm190_vm1 = vcmp.lt.s32.totalorder %v1114_v47, 4 }
  0x5d   :  { %vm265_vm3 = vmand %vm137_vm11, %vm201_vm12  ;;  %vm130_vm11 = vcmp.ge.s32.totalorder %v1117_v48, 0  ;;  %vm194_vm12 = vcmp.lt.s32.totalorder %v1117_v48, 4 }
  0x5e   :  { %vm1259_vm6 = vmpackc.low %vm265_vm3, %vm261_vm7  ;;  %vm11_vm3 = vcmp.gt.f32.partialorder %v9_v24, 0.0 }
  0x5f   :  { %v1630_v29 = vsel %vm1259_vm6, 4294967295, %v1629_v29  ;;  %748 = vmatpush1.bf16.msk.msra.mxu1 %vm1259_vm6, %v884_v23  ;;  %vm252_vm2 = vmand %vm124_vm9, %vm188_vm4  ;;  %vm123_vm9 = vcmp.ge.s32.totalorder %v1121_v50, 0  ;;  %vm187_vm4 = vcmp.lt.s32.totalorder %v1121_v50, 4  ;;  %vm191_vm6 = vcmp.lt.s32.totalorder %v1124_v51, 4 }
  0x60   :  { %vm256_vm15 = vmand %vm128_vm0, %vm192_vm8  ;;  %vm127_vm8 = vcmp.ge.s32.totalorder %v1124_v51, 0  ;;  %v13_v34 = vsel %vm11_vm3, %v12_v30, %v10_v27 }
  0x61   :  { %vm1270_vm5 = vmpackc.low %vm256_vm15, %vm252_vm2  ;;  %v14_v38 = vpack.c.bf16 %v13_v34, %v13_v34 }
  0x62   :  { %v1632_v31 = vsel %vm1270_vm5, 4294967295, %v1631_v31  ;;  %718 = vmatprep.subr.msk.bf16.mxu0 %vm1270_vm5, %v884_v23  ;;  %vm254_vm7 = vmand %vm126_vm13, %vm190_vm1  ;;  %vm125_vm13 = vcmp.ge.s32.totalorder %v1127_v52, 0  ;;  %vm189_vm1 = vcmp.lt.s32.totalorder %v1127_v52, 4 }
  0x63   :  { %vm258_vm0 = vmand %vm130_vm11, %vm194_vm12  ;;  %vm129_vm11 = vcmp.ge.s32.totalorder %v1130_v54, 0  ;;  %vm193_vm12 = vcmp.lt.s32.totalorder %v1130_v54, 4  ;;  %v15_v40 = vunpack.c.l.bf16 %v14_v38 }
  0x64   :  { %vm1281_vm10 = vmpackc.low %vm258_vm0, %vm254_vm7  ;;  %vm1641_vm0 = vnez %v1578_v28 }
  0x65   :  { %750 = vmatprep.subr.msk.bf16.mxu1 %vm1281_vm10, %v884_v23  ;;  %vm251_vm2 = vmand %vm123_vm9, %vm187_vm4  ;;  %vm1637_vm9 = vnez %v1574_v20  ;;  %vm1640_vm4 = vnez %v1576_v25  ;;  %v16_v42 = vsub.f32 %v13_v34, %v15_v40 }
  0x66   :  { %vm255_vm15 = vmand %vm127_vm8, %vm191_vm6  ;;  %vm1642_vm8 = vnez %v1582_v37 }
  0x67   :  { %vm1292_vm5 = vmpackc.low %vm255_vm15, %vm251_vm2  ;;  %vm1643_vm2 = vnez %v1580_v33  ;;  %vm1646_vm15 = vnez %v1590_v53  ;;  %v17_v43 = vpack.c.bf16 %v16_v42, %v16_v42 }
  0x68   :  { %720 = vmatpush1.bf16.msk.msra.mxu0 %vm1292_vm5, %v884_v23  ;;  %vm253_vm3 = vmand %vm125_vm13, %vm189_vm1  ;;  %vm1644_vm13 = vnez %v1584_v41  ;;  %vm1645_vm1 = vnez %v1586_v44 }
  0x69   :  { %vm257_vm7 = vmand %vm129_vm11, %vm193_vm12  ;;  %754 = vmatprep.subr.msk.bf16.mxu0 %vm1637_vm9, %v884_v23  ;;  %vm1647_vm11 = vnez %v1588_v49  ;;  %vm1648_vm12 = vnez %v1592_v57 }
  0x6a   :  { %vm1302_vm6 = vmpackc.low %vm257_vm7, %vm253_vm3  ;;  %vm1649_vm3 = vnez %v1594_v63  ;;  %vm1650_vm7 = vnez %v1598_v19 }
  0x6b   :  { %752 = vmatpush1.bf16.msk.msra.mxu1 %vm1302_vm6, %v884_v23  ;;  %444 = vmatmul.mubr.bf16.vlgmr.msra.gmra.mxu0 %v14_v38 }
  0x6c   :  { %786 = vmatprep.subr.msk.bf16.mxu1 %vm1640_vm4, %v884_v23  ;;  %756 = vmatpush1.bf16.msk.msra.mxu0 %vm1641_vm0, %v884_v23 }
  0x6d   :  { %758 = vmatprep.subr.msk.bf16.mxu0 %vm1642_vm8, %v884_v23  ;;  %533 = vmatprep.mubr.bf16.mxu0 %v883_v1 }
  0x6e   :  { %485 = vmatmul.mubr.bf16.vlgmr.msra.gmra.mxu1 %v14_v38 }
  0x6f   :  { %788 = vmatpush1.bf16.msk.msra.mxu1 %vm1643_vm2, %v884_v23  ;;  %574 = vmatprep.mubr.bf16.mxu1 %v883_v1 }
  0x70   :  { %790 = vmatprep.subr.msk.bf16.mxu1 %vm1644_vm13, %v884_v23  ;;  %760 = vmatpush1.bf16.msk.msra.mxu0 %vm1645_vm1, %v884_v23  ;;  %vm1651_vm1 = vnez %v1596_v12 }
  0x71   :  { %762 = vmatprep.subr.msk.bf16.mxu0 %vm1646_vm15, %v884_v23  ;;  %vm1652_vm15 = vnez %v1601_v35 }
  0x73   :  { %792 = vmatpush1.bf16.msk.msra.mxu1 %vm1647_vm11, %v884_v23  ;;  %vm1653_vm11 = vnez %v1603_v45 }
  0x74   :  { %794 = vmatprep.subr.msk.bf16.mxu1 %vm1648_vm12, %v884_v23  ;;  %764 = vmatpush1.bf16.msk.msra.mxu0 %vm1649_vm3, %v884_v23  ;;  %vm1654_vm12 = vnez %v1608_v60  ;;  %vm1655_vm3 = vnez %v1606_v55 }
  0x75   :  { %766 = vmatprep.subr.msk.bf16.mxu0 %vm1650_vm7, %v884_v23  ;;  %vm1656_vm7 = vnez %v1610_v4 }
  0x77   :  { %796 = vmatpush1.bf16.msk.msra.mxu1 %vm1651_vm1, %v884_v23  ;;  %vm1657_vm1 = vnez %v1612_v9 }
  0x78   :  { %798 = vmatprep.subr.msk.bf16.mxu1 %vm1652_vm15, %v884_v23  ;;  %768 = vmatpush1.bf16.msk.msra.mxu0 %vm1653_vm11, %v884_v23  ;;  %vm1658_vm15 = vnez %v1616_v7 }
  0x79   :  { %770 = vmatprep.subr.msk.bf16.mxu0 %vm1654_vm12, %v884_v23  ;;  %vm1659_vm12 = vnez %v1614_v6 }
  0x7b   :  { %800 = vmatpush1.bf16.msk.msra.mxu1 %vm1655_vm3, %v884_v23 }
  0x7c   :  { %802 = vmatprep.subr.msk.bf16.mxu1 %vm1656_vm7, %v884_v23  ;;  %772 = vmatpush1.bf16.msk.msra.mxu0 %vm1657_vm1, %v884_v23  ;;  %vm1660_vm7 = vnez %v1620_v18  ;;  %vm1661_vm1 = vnez %v1624_v21 }
  0x7d   :  { %774 = vmatprep.subr.msk.bf16.mxu0 %vm1658_vm15, %v884_v23  ;;  %vm1662_vm15 = vnez %v1622_v16 }
  0x7f   :  { %804 = vmatpush1.bf16.msk.msra.mxu1 %vm1659_vm12, %v884_v23  ;;  %vm1663_vm12 = vnez %v1626_v22 }
  0x80   :  { %806 = vmatprep.subr.msk.bf16.mxu1 %vm1194_vm14, %v884_v23  ;;  %776 = vmatpush1.bf16.msk.msra.mxu0 %vm1660_vm7, %v884_v23  ;;  %vm1664_vm14 = vnez %v1628_v26  ;;  %vm1665_vm7 = vnez %v1632_v31 }
  0x81   :  { %778 = vmatprep.subr.msk.bf16.mxu0 %vm1661_vm1, %v884_v23  ;;  %vm1666_vm1 = vnez %v1630_v29 }
  0x83   :  { %808 = vmatpush1.bf16.msk.msra.mxu1 %vm1662_vm15, %v884_v23 }
  0x84   :  { %810 = vmatprep.subr.msk.bf16.mxu1 %vm1663_vm12, %v884_v23  ;;  %780 = vmatpush1.bf16.msk.msra.mxu0 %vm1664_vm14, %v884_v23 }
  0x85   :  { %782 = vmatprep.subr.msk.bf16.mxu0 %vm1665_vm7, %v884_v23 }
  0x87   :  { %812 = vmatpush1.bf16.msk.msra.mxu1 %vm1666_vm1, %v884_v23 }
  0x88   :  { %814 = vmatprep.subr.msk.bf16.mxu1 %vm1281_vm10, %v884_v23  ;;  %784 = vmatpush1.bf16.msk.msra.mxu0 %vm1292_vm5, %v884_v23 }
  0x89   :  { %818 = vmatprep.subr.msk.bf16.mxu0 %vm1637_vm9, %v884_v23  ;;  %vm1667_vm9 = vnez %v1586_v44 }
  0x8b   :  { %816 = vmatpush1.bf16.msk.msra.mxu1 %vm1302_vm6, %v884_v23  ;;  %534 = vmatmul.mubr.bf16.vlgmr.msra.gmra.mxu0 %v17_v43 }
  0x8c   :  { %850 = vmatprep.subr.msk.bf16.mxu1 %vm1640_vm4, %v884_v23  ;;  %820 = vmatpush1.bf16.msk.msra.mxu0 %vm1641_vm0, %v884_v23  ;;  %vm1668_vm4 = vnez %v1590_v53  ;;  %vm1669_vm0 = vnez %v1588_v49 }
  0x8d   :  { %822 = vmatprep.subr.msk.bf16.mxu0 %vm1642_vm8, %v884_v23  ;;  %627 = vmatprep.mubr.bf16.mxu0 %v883_v1  ;;  %vm1670_vm8 = vnez %v1592_v57 }
  0x8e   :  { %575 = vmatmul.mubr.bf16.vlgmr.msra.gmra.mxu1 %v17_v43 }
  0x8f   :  { %852 = vmatpush1.bf16.msk.msra.mxu1 %vm1643_vm2, %v884_v23  ;;  %668 = vmatprep.mubr.bf16.mxu1 %v883_v1  ;;  %vm1671_vm2 = vnez %v1594_v63  ;;  %v18_v1 = vunpack.c.l.bf16 %v17_v43 }
  0x90   :  { %854 = vmatprep.subr.msk.bf16.mxu1 %vm1644_vm13, %v884_v23  ;;  %824 = vmatpush1.bf16.msk.msra.mxu0 %vm1667_vm9, %v884_v23  ;;  %vm1672_vm13 = vnez %v1598_v19  ;;  %vm1673_vm9 = vnez %v1596_v12 }
  0x91   :  { %826 = vmatprep.subr.msk.bf16.mxu0 %vm1668_vm4, %v884_v23  ;;  %vm1674_vm4 = vnez %v1601_v35  ;;  %v19_v20 = vsub.f32 %v16_v42, %v18_v1 }
  0x93   :  { %856 = vmatpush1.bf16.msk.msra.mxu1 %vm1669_vm0, %v884_v23  ;;  %vm1675_vm0 = vnez %v1608_v60  ;;  %v20_v25 = vpack.c.bf16 %v19_v20, %v19_v20 }
  0x94   :  { %858 = vmatprep.subr.msk.bf16.mxu1 %vm1670_vm8, %v884_v23  ;;  %828 = vmatpush1.bf16.msk.msra.mxu0 %vm1671_vm2, %v884_v23  ;;  %vm1676_vm8 = vnez %v1610_v4  ;;  %vm1677_vm2 = vnez %v1612_v9 }
  0x95   :  { %830 = vmatprep.subr.msk.bf16.mxu0 %vm1672_vm13, %v884_v23  ;;  %vm1678_vm13 = vnez %v1616_v7 }
  0x97   :  { %860 = vmatpush1.bf16.msk.msra.mxu1 %vm1673_vm9, %v884_v23  ;;  %vm1681_vm9 = vnez %v1620_v18 }
  0x98   :  { %862 = vmatprep.subr.msk.bf16.mxu1 %vm1674_vm4, %v884_v23  ;;  %832 = vmatpush1.bf16.msk.msra.mxu0 %vm1653_vm11, %v884_v23  ;;  %vm1679_vm11 = vnez %v1614_v6  ;;  %vm1682_vm4 = vnez %v1624_v21 }
  0x99   :  { %834 = vmatprep.subr.msk.bf16.mxu0 %vm1675_vm0, %v884_v23 }
  0x9b   :  { %864 = vmatpush1.bf16.msk.msra.mxu1 %vm1655_vm3, %v884_v23  ;;  %vm1680_vm3 = vnez %v1618_v3 }
  0x9c   :  { %866 = vmatprep.subr.msk.bf16.mxu1 %vm1676_vm8, %v884_v23  ;;  %836 = vmatpush1.bf16.msk.msra.mxu0 %vm1677_vm2, %v884_v23 }
  0x9d   :  { %838 = vmatprep.subr.msk.bf16.mxu0 %vm1678_vm13, %v884_v23 }
  0x9f   :  { %868 = vmatpush1.bf16.msk.msra.mxu1 %vm1679_vm11, %v884_v23 }
  0xa0   :  { %870 = vmatprep.subr.msk.bf16.mxu1 %vm1680_vm3, %v884_v23  ;;  %840 = vmatpush1.bf16.msk.msra.mxu0 %vm1681_vm9, %v884_v23 }
  0xa1   :  { %842 = vmatprep.subr.msk.bf16.mxu0 %vm1682_vm4, %v884_v23 }
  0xa3   :  { %872 = vmatpush1.bf16.msk.msra.mxu1 %vm1662_vm15, %v884_v23 }
  0xa4   :  { %874 = vmatprep.subr.msk.bf16.mxu1 %vm1663_vm12, %v884_v23  ;;  %844 = vmatpush1.bf16.msk.msra.mxu0 %vm1664_vm14, %v884_v23 }
  0xa5   :  { %846 = vmatprep.subr.msk.bf16.mxu0 %vm1665_vm7, %v884_v23 }
  0xa7   :  { %876 = vmatpush1.bf16.msk.msra.mxu1 %vm1666_vm1, %v884_v23 }
  0xa8   :  { %878 = vmatprep.subr.msk.bf16.mxu1 %vm1281_vm10, %v884_v23  ;;  %848 = vmatpush1.bf16.msk.msra.mxu0 %vm1292_vm5, %v884_v23 }
  0xab   :  { %880 = vmatpush1.bf16.msk.msra.mxu1 %vm1302_vm6, %v884_v23  ;;  %628 = vmatmul.mubr.bf16.vlgmr.msra.gmra.mxu0 %v20_v25 }
  0xae   :  { %669 = vmatmul.mubr.bf16.vlgmr.msra.gmra.mxu1 %v20_v25 }
 0x12b   :  { %v445_v28 = vpop.f32.mrf.mxu0 }
 0x12d   :  { %v447_v33 = vpop.f32.mrf.mxu0 }
 0x12e   :  { %v486_v37 = vpop.f32.mrf.mxu1 }
 0x12f   :  { %v449_v41 = vpop.f32.mrf.mxu0 }
 0x130   :  { %v488_v44 = vpop.f32.mrf.mxu1 }
 0x131   :  { %v450_v49 = vpop.f32.mrf.mxu0 }
 0x132   :  { %v490_v53 = vpop.f32.mrf.mxu1 }
 0x134   :  { %v491_v57 = vpop.f32.mrf.mxu1 }
 0x14b   :  { %v535_v63 = vpop.f32.mrf.mxu0 }
 0x14c   :  { %v583_v48 = vadd.f32 %v535_v63, %v445_v28 }
 0x14d   :  { %v537_v12 = vpop.f32.mrf.mxu0 }
 0x14e   :  { %v576_v19 = vpop.f32.mrf.mxu1  ;;  %v584_v50 = vadd.f32 %v537_v12, %v447_v33 }
 0x14f   :  { %v539_v35 = vpop.f32.mrf.mxu0  ;;  %v585_v52 = vadd.f32 %v576_v19, %v486_v37 }
 0x150   :  { %v578_v45 = vpop.f32.mrf.mxu1 }
 0x151   :  { %v540_v2 = vpop.f32.mrf.mxu0  ;;  %v586_v58 = vadd.f32 %v578_v45, %v488_v44 }
 0x152   :  { %v580_v46 = vpop.f32.mrf.mxu1 }
 0x154   :  { %v581_v47 = vpop.f32.mrf.mxu1 }
 0x16b   :  { %v629_v23 = vpop.f32.mrf.mxu0 }
 0x16c   :  { %v677_v51 = vadd.f32 %v629_v23, %v583_v48 }
 0x16d   :  { %v631_v54 = vpop.f32.mrf.mxu0 }
 0x16e   :  { %681 = vst [vmem:[%s1515_s1] sm:$0xff] %v677_v51  ;;  %v670_v55 = vpop.f32.mrf.mxu1  ;;  %v678_v56 = vadd.f32 %v631_v54, %v584_v50 }
 0x16f   :  { %v679_v59 = vadd.f32 %v670_v55, %v585_v52  ;;  %v633_v60 = vpop.f32.mrf.mxu0 }
 0x170   :  { %682 = vst [vmem:[%s1515_s1 + $0x8] sm:$0xff] %v678_v56  ;;  %v672_v61 = vpop.f32.mrf.mxu1 }
 0x171   :  { %683 = vst [vmem:[%s1515_s1 + $0x10] sm:$0xff] %v679_v59  ;;  %v680_v62 = vadd.f32 %v672_v61, %v586_v58  ;;  %v634_v0 = vpop.f32.mrf.mxu0 }
 0x172   :  { %v674_v4 = vpop.f32.mrf.mxu1 }
 0x173   :  { %684 = vst [vmem:[%s1515_s1 + $0x18] sm:$0xff] %v680_v62 }
 0x174   :  { %v675_v5 = vpop.f32.mrf.mxu1 }

</bundles_post_ra>
